<compile_context>
chip_gen: v7x
topology: tpu7x:2x2x1
jax: 0.10.0
libtpu: 0.0.40
codegen_flags: <defaults>
</compile_context>

<pallas_src>
import functools

import jax
import jax.numpy as jnp
import numpy as np
from jax.experimental import pallas as pl
from jax.experimental.pallas import tpu as pltpu


def cbam_kernel(x_ref, w1t_ref, w2t_ref, wm_ref, o_ref, *, width, inv_s, inv_c):
    """TB batch elements per grid step.

    x_ref   : (TB, C, S)  input block, S = H*W (lane-dense)
    w1t_ref : (C, Cr)     ChannelAttention.fc1 weight, transposed in wrapper
    w2t_ref : (Cr, C)     ChannelAttention.fc2 weight, transposed in wrapper
    wm_ref  : (18, S)     3x3 conv tap weights pre-multiplied with zero-padding masks
                          (rows 0..8 -> avg plane, rows 9..17 -> max plane)
    o_ref   : (TB, C, S)  output block
    """
    x = x_ref[...]                                            # (TB, C, S) f32
    TB, C, S = x.shape

    # ---------------- Channel attention (avg/max branches fused) ----------------
    avg_c = jnp.sum(x, axis=2) * inv_s                        # (TB, C) global avg pool
    max_c = jnp.max(x, axis=2)                                # (TB, C) global max pool
    pooled = jnp.concatenate([avg_c, max_c], axis=0)          # (2*TB, C)

    h = jnp.maximum(
        jnp.dot(pooled, w1t_ref[...], preferred_element_type=jnp.float32), 0.0)  # (2TB, Cr)
    logits = jnp.dot(h, w2t_ref[...], preferred_element_type=jnp.float32)        # (2TB, C)
    ca = 1.0 / (1.0 + jnp.exp(-(logits[:TB] + logits[TB:])))  # sigmoid, (TB, C)

    x_ca = x * ca[:, :, None]                                 # (TB, C, S)

    # ---------------- Spatial attention ----------------
    avg_s = jnp.sum(x_ca, axis=1) * inv_c                     # (TB, S) channel mean
    max_s = jnp.max(x_ca, axis=1)                             # (TB, S) channel max

    # 3x3 conv (padding=1) in flattened layout: 9 static lane rolls; zero-padding
    # boundary handling is baked into wm (zero where the shifted pixel is outside).
    wm = wm_ref[...]                                          # (18, S)
    conv = jnp.zeros_like(avg_s)                              # (TB, S)
    j = 0
    for dy in (-1, 0, 1):
        for dx in (-1, 0, 1):
            k = dy * width + dx
            if k == 0:
                ra, rm = avg_s, max_s
            else:
                sh = (-k) % S
                ra = pltpu.roll(avg_s, shift=sh, axis=1)
                rm = pltpu.roll(max_s, shift=sh, axis=1)
            conv = conv + wm[j][None, :] * ra + wm[9 + j][None, :] * rm
            j += 1
    sa = 1.0 / (1.0 + jnp.exp(-conv))                         # sigmoid, (TB, S)

    o_ref[...] = (x_ca * sa[:, None, :]).astype(o_ref.dtype)


def _pick_tb(B, C, S, budget_bytes=20 << 20):
    """Largest divisor of B whose double-buffered in+out blocks fit the VMEM budget,
    while keeping >= 2 grid steps when B >= 2 (v7x dual-TC / megacore)."""
    per_elem = 4 * C * S * 4                      # 2x in + 2x out buffers, f32
    cap = max(1, budget_bytes // max(per_elem, 1))
    if B >= 2:
        cap = min(cap, B // 2)
    cap = max(1, min(cap, B))
    tb = 1
    for d in range(1, cap + 1):
        if B % d == 0:
            tb = d
    return tb


def cbam_block(x, w_fc1, w_fc2, w_sp):
    """x: (B, C, H, W). w_fc1: (C//ratio, C). w_fc2: (C, C//ratio).
    w_sp: (1, 2, 3, 3) SpatialAttention conv1 weight. Returns (B, C, H, W)."""
    B, C, H, W = x.shape
    S = H * W
    Cr = w_fc1.shape[0]
    assert w_fc1.shape == (Cr, C) and w_fc2.shape == (C, Cr)
    assert w_sp.shape == (1, 2, 3, 3)

    x_flat = x.reshape(B, C, S)                   # contiguous, no transpose

    # Pre-fold conv tap weights with zero-padding validity masks -> (18, S).
    rows = np.repeat(np.arange(H), W)
    cols = np.tile(np.arange(W), H)
    masks = []
    for dy in (-1, 0, 1):
        for dx in (-1, 0, 1):
            valid = ((rows + dy >= 0) & (rows + dy < H) &
                     (cols + dx >= 0) & (cols + dx < W))
            masks.append(valid.astype(np.float32))
    mask9 = jnp.asarray(np.stack(masks))          # (9, S) static
    w_taps = w_sp.reshape(2, 9)                   # [branch(avg,max), tap]
    wm = jnp.concatenate([w_taps[0][:, None] * mask9,
                          w_taps[1][:, None] * mask9], axis=0)   # (18, S)

    # Transpose the tiny MLP weights once here so the kernel runs plain NN matmuls.
    w1t = jnp.transpose(w_fc1)                    # (C, Cr)
    w2t = jnp.transpose(w_fc2)                    # (Cr, C)

    TB = _pick_tb(B, C, S)
    grid = (B // TB,)

    cost = pl.CostEstimate(
        flops=int(B * (6 * C * S + 36 * S + 8 * C * Cr)),
        transcendentals=int(B * (C + S)),
        bytes_accessed=int(4 * (2 * B * C * S + 2 * C * Cr + 18 * S)),
    )

    kernel = functools.partial(cbam_kernel, width=W, inv_s=1.0 / S, inv_c=1.0 / C)

    out = pl.pallas_call(
        kernel,
        out_shape=jax.ShapeDtypeStruct((B, C, S), jnp.float32),
        grid_spec=pltpu.PrefetchScalarGridSpec(
            num_scalar_prefetch=0,
            grid=grid,
            in_specs=[
                pl.BlockSpec((TB, C, S), lambda b: (b, 0, 0)),
                pl.BlockSpec((C, Cr), lambda b: (0, 0)),
                pl.BlockSpec((Cr, C), lambda b: (0, 0)),
                pl.BlockSpec((18, S), lambda b: (0, 0)),
            ],
            out_specs=pl.BlockSpec((TB, C, S), lambda b: (b, 0, 0)),
        ),
        compiler_params=pltpu.CompilerParams(
            dimension_semantics=("parallel",),
            vmem_limit_bytes=48 * 1024 * 1024,
        ),
        cost_estimate=cost,
    )(x_flat, w1t, w2t, wm)

    return out.reshape(B, C, H, W)


def reference(x, w_fc1, w_fc2, w_sp):
    """Pure-JAX reference reproducing the PyTorch cbam_block forward."""
    hp = jax.lax.Precision.HIGHEST
    avg = jnp.mean(x, axis=(2, 3), keepdims=True)               # AdaptiveAvgPool2d(1)
    mx = jnp.max(x, axis=(2, 3), keepdims=True)                 # AdaptiveMaxPool2d(1)

    def mlp(v):
        h = jnp.maximum(jnp.einsum('oc,bcij->boij', w_fc1, v, precision=hp), 0.0)
        return jnp.einsum('co,boij->bcij', w_fc2, h, precision=hp)

    ca = jax.nn.sigmoid(mlp(avg) + mlp(mx))
    x = x * ca
    avg_s = jnp.mean(x, axis=1, keepdims=True)
    max_s = jnp.max(x, axis=1, keepdims=True)
    cat = jnp.concatenate([avg_s, max_s], axis=1)               # (B, 2, H, W)
    conv = jax.lax.conv_general_dilated(
        cat, w_sp, window_strides=(1, 1), padding='SAME',
        dimension_numbers=('NCHW', 'OIHW', 'NCHW'), precision=hp)
    sa = jax.nn.sigmoid(conv)
    return x * sa


if __name__ == "__main__":
    B, C, H, W = 4, 16, 16, 16
    ratio = 8
    Cr = C // ratio

    key = jax.random.PRNGKey(0)
    kx, k1, k2, k3 = jax.random.split(key, 4)
    x = jax.random.normal(kx, (B, C, H, W), jnp.float32)
    # Conv2d(C, C//ratio, 1, bias=False) weight (C//ratio, C, 1, 1) squeezed:
    w_fc1 = jax.random.normal(k1, (Cr, C), jnp.float32) * 0.3
    # Conv2d(C//ratio, C, 1, bias=False) weight (C, C//ratio, 1, 1) squeezed:
    w_fc2 = jax.random.normal(k2, (C, Cr), jnp.float32) * 0.3
    # SpatialAttention Conv2d(2, 1, 3, padding=1, bias=False) weight:
    w_sp = jax.random.normal(k3, (1, 2, 3, 3), jnp.float32) * 0.3

    out = cbam_block(x, w_fc1, w_fc2, w_sp)
    out = jax.block_until_ready(out)

    ref = reference(x, w_fc1, w_fc2, w_sp)
    np.testing.assert_allclose(np.asarray(out), np.asarray(ref), rtol=1e-4, atol=1e-5)
    print("KERNEL_OK")
</pallas_src>

<mosaic_0001>
module attributes {stable_mosaic.version = 11 : i64} {
  func.func @cbam_kernel(%arg0: i32, %arg1: memref<2x16x256xf32, #tpu.memory_space<vmem>>, %arg2: memref<16x2xf32, #tpu.memory_space<vmem>>, %arg3: memref<2x16xf32, #tpu.memory_space<vmem>>, %arg4: memref<18x256xf32, #tpu.memory_space<vmem>>, %arg5: memref<2x16x256xf32, #tpu.memory_space<vmem>>) attributes {dimension_semantics = [#tpu.dimension_semantics<parallel>], iteration_bounds = array<i64: 2>, scalar_prefetch = 0 : i64, scratch_operands = 0 : i64, tpu.core_type = #tpu.core_type<tc>, window_params = [{transform_indices = @transform_0, window_bounds = array<i64: 2, 16, 256>}, {pipeline_mode = #tpu.pipeline_mode<synchronous>, transform_indices = @transform_1, window_bounds = array<i64: 16, 2>}, {pipeline_mode = #tpu.pipeline_mode<synchronous>, transform_indices = @transform_2, window_bounds = array<i64: 2, 16>}, {pipeline_mode = #tpu.pipeline_mode<synchronous>, transform_indices = @transform_3, window_bounds = array<i64: 18, 256>}, {transform_indices = @transform_4, window_bounds = array<i64: 2, 16, 256>}]} {
    %c0 = arith.constant 0 : index
    %c0_0 = arith.constant 0 : index
    %c0_1 = arith.constant 0 : index
    %0 = vector.load %arg1[%c0, %c0_0, %c0_1] : memref<2x16x256xf32, #tpu.memory_space<vmem>>, vector<2x16x256xf32>
    %cst = arith.constant dense<0.000000e+00> : vector<2x16xf32>
    %1 = vector.multi_reduction <add>, %0, %cst [2] : vector<2x16x256xf32> to vector<2x16xf32>
    %cst_2 = arith.constant 3.906250e-03 : f32
    %2 = vector.broadcast %cst_2 : f32 to vector<2x16xf32>
    %3 = arith.mulf %1, %2 : vector<2x16xf32>
    %cst_3 = arith.constant dense<0xFF800000> : vector<2x16xf32>
    %4 = vector.multi_reduction <maximumf>, %0, %cst_3 [2] : vector<2x16x256xf32> to vector<2x16xf32>
    %5 = tpu.concatenate %3, %4 in 0 : vector<2x16xf32>, vector<2x16xf32> -> vector<4x16xf32>
    %c0_4 = arith.constant 0 : index
    %c0_5 = arith.constant 0 : index
    %6 = vector.load %arg2[%c0_4, %c0_5] : memref<16x2xf32, #tpu.memory_space<vmem>>, vector<16x2xf32>
    %cst_6 = arith.constant dense<0.000000e+00> : vector<4x2xf32>
    %7 = tpu.matmul %5, %6, %cst_6 {dimension_numbers = #tpu.dot_dimension_numbers<[1], [0], [0], [1], [0, 0, 1, 1], [], []>} : vector<4x16xf32>, vector<16x2xf32>, vector<4x2xf32> -> vector<4x2xf32>
    %cst_7 = arith.constant 0.000000e+00 : f32
    %8 = vector.broadcast %cst_7 : f32 to vector<4x2xf32>
    %9 = arith.maximumf %7, %8 : vector<4x2xf32>
    %c0_8 = arith.constant 0 : index
    %c0_9 = arith.constant 0 : index
    %10 = vector.load %arg3[%c0_8, %c0_9] : memref<2x16xf32, #tpu.memory_space<vmem>>, vector<2x16xf32>
    %cst_10 = arith.constant dense<0.000000e+00> : vector<4x16xf32>
    %11 = tpu.matmul %9, %10, %cst_10 {dimension_numbers = #tpu.dot_dimension_numbers<[1], [0], [0], [1], [0, 0, 1, 1], [], []>} : vector<4x2xf32>, vector<2x16xf32>, vector<4x16xf32> -> vector<4x16xf32>
    %12 = vector.extract_strided_slice %11 {offsets = [0, 0], sizes = [2, 16], strides = [1, 1]} : vector<4x16xf32> to vector<2x16xf32>
    %13 = vector.extract_strided_slice %11 {offsets = [2, 0], sizes = [2, 16], strides = [1, 1]} : vector<4x16xf32> to vector<2x16xf32>
    %14 = arith.addf %12, %13 : vector<2x16xf32>
    %cst_11 = arith.constant 0.000000e+00 : f32
    %15 = vector.broadcast %cst_11 : f32 to vector<2x16xf32>
    %16 = arith.subf %15, %14 : vector<2x16xf32>
    %17 = math.exp %16 : vector<2x16xf32>
    %cst_12 = arith.constant 1.000000e+00 : f32
    %18 = vector.broadcast %cst_12 : f32 to vector<2x16xf32>
    %19 = arith.addf %18, %17 : vector<2x16xf32>
    %cst_13 = arith.constant 1.000000e+00 : f32
    %20 = vector.broadcast %cst_13 : f32 to vector<2x16xf32>
    %21 = arith.divf %20, %19 : vector<2x16xf32>
    %22 = vector.shape_cast %21 : vector<2x16xf32> to vector<2x16x1xf32>
    %23 = vector.broadcast %22 : vector<2x16x1xf32> to vector<2x16x256xf32>
    %24 = arith.mulf %0, %23 : vector<2x16x256xf32>
    %cst_14 = arith.constant dense<0.000000e+00> : vector<2x256xf32>
    %25 = vector.multi_reduction <add>, %24, %cst_14 [1] : vector<2x16x256xf32> to vector<2x256xf32>
    %cst_15 = arith.constant 6.250000e-02 : f32
    %26 = vector.broadcast %cst_15 : f32 to vector<2x256xf32>
    %27 = arith.mulf %25, %26 : vector<2x256xf32>
    %cst_16 = arith.constant dense<0xFF800000> : vector<2x256xf32>
    %28 = vector.multi_reduction <maximumf>, %24, %cst_16 [1] : vector<2x16x256xf32> to vector<2x256xf32>
    %c0_17 = arith.constant 0 : index
    %c0_18 = arith.constant 0 : index
    %29 = vector.load %arg4[%c0_17, %c0_18] : memref<18x256xf32, #tpu.memory_space<vmem>>, vector<18x256xf32>
    %cst_19 = arith.constant 0.000000e+00 : f32
    %30 = vector.broadcast %cst_19 : f32 to vector<2x256xf32>
    %c17_i32 = arith.constant 17 : i32
    %31 = tpu.dynamic_rotate %27 by %c17_i32 dim 1 : vector<2x256xf32>, i32 -> vector<2x256xf32>
    %c17_i32_20 = arith.constant 17 : i32
    %32 = tpu.dynamic_rotate %28 by %c17_i32_20 dim 1 : vector<2x256xf32>, i32 -> vector<2x256xf32>
    %33 = vector.extract_strided_slice %29 {offsets = [0, 0], sizes = [1, 256], strides = [1, 1]} : vector<18x256xf32> to vector<1x256xf32>
    %34 = vector.shape_cast %33 : vector<1x256xf32> to vector<256xf32>
    %35 = vector.shape_cast %34 : vector<256xf32> to vector<1x256xf32>
    %36 = vector.broadcast %35 : vector<1x256xf32> to vector<2x256xf32>
    %37 = arith.mulf %36, %31 : vector<2x256xf32>
    %38 = arith.addf %30, %37 : vector<2x256xf32>
    %39 = vector.extract_strided_slice %29 {offsets = [9, 0], sizes = [1, 256], strides = [1, 1]} : vector<18x256xf32> to vector<1x256xf32>
    %40 = vector.shape_cast %39 : vector<1x256xf32> to vector<256xf32>
    %41 = vector.shape_cast %40 : vector<256xf32> to vector<1x256xf32>
    %42 = vector.broadcast %41 : vector<1x256xf32> to vector<2x256xf32>
    %43 = arith.mulf %42, %32 : vector<2x256xf32>
    %44 = arith.addf %38, %43 : vector<2x256xf32>
    %c16_i32 = arith.constant 16 : i32
    %45 = tpu.dynamic_rotate %27 by %c16_i32 dim 1 : vector<2x256xf32>, i32 -> vector<2x256xf32>
    %c16_i32_21 = arith.constant 16 : i32
    %46 = tpu.dynamic_rotate %28 by %c16_i32_21 dim 1 : vector<2x256xf32>, i32 -> vector<2x256xf32>
    %47 = vector.extract_strided_slice %29 {offsets = [1, 0], sizes = [1, 256], strides = [1, 1]} : vector<18x256xf32> to vector<1x256xf32>
    %48 = vector.shape_cast %47 : vector<1x256xf32> to vector<256xf32>
    %49 = vector.shape_cast %48 : vector<256xf32> to vector<1x256xf32>
    %50 = vector.broadcast %49 : vector<1x256xf32> to vector<2x256xf32>
    %51 = arith.mulf %50, %45 : vector<2x256xf32>
    %52 = arith.addf %44, %51 : vector<2x256xf32>
    %53 = vector.extract_strided_slice %29 {offsets = [10, 0], sizes = [1, 256], strides = [1, 1]} : vector<18x256xf32> to vector<1x256xf32>
    %54 = vector.shape_cast %53 : vector<1x256xf32> to vector<256xf32>
    %55 = vector.shape_cast %54 : vector<256xf32> to vector<1x256xf32>
    %56 = vector.broadcast %55 : vector<1x256xf32> to vector<2x256xf32>
    %57 = arith.mulf %56, %46 : vector<2x256xf32>
    %58 = arith.addf %52, %57 : vector<2x256xf32>
    %c15_i32 = arith.constant 15 : i32
    %59 = tpu.dynamic_rotate %27 by %c15_i32 dim 1 : vector<2x256xf32>, i32 -> vector<2x256xf32>
    %c15_i32_22 = arith.constant 15 : i32
    %60 = tpu.dynamic_rotate %28 by %c15_i32_22 dim 1 : vector<2x256xf32>, i32 -> vector<2x256xf32>
    %61 = vector.extract_strided_slice %29 {offsets = [2, 0], sizes = [1, 256], strides = [1, 1]} : vector<18x256xf32> to vector<1x256xf32>
    %62 = vector.shape_cast %61 : vector<1x256xf32> to vector<256xf32>
    %63 = vector.shape_cast %62 : vector<256xf32> to vector<1x256xf32>
    %64 = vector.broadcast %63 : vector<1x256xf32> to vector<2x256xf32>
    %65 = arith.mulf %64, %59 : vector<2x256xf32>
    %66 = arith.addf %58, %65 : vector<2x256xf32>
    %67 = vector.extract_strided_slice %29 {offsets = [11, 0], sizes = [1, 256], strides = [1, 1]} : vector<18x256xf32> to vector<1x256xf32>
    %68 = vector.shape_cast %67 : vector<1x256xf32> to vector<256xf32>
    %69 = vector.shape_cast %68 : vector<256xf32> to vector<1x256xf32>
    %70 = vector.broadcast %69 : vector<1x256xf32> to vector<2x256xf32>
    %71 = arith.mulf %70, %60 : vector<2x256xf32>
    %72 = arith.addf %66, %71 : vector<2x256xf32>
    %c1_i32 = arith.constant 1 : i32
    %73 = tpu.dynamic_rotate %27 by %c1_i32 dim 1 : vector<2x256xf32>, i32 -> vector<2x256xf32>
    %c1_i32_23 = arith.constant 1 : i32
    %74 = tpu.dynamic_rotate %28 by %c1_i32_23 dim 1 : vector<2x256xf32>, i32 -> vector<2x256xf32>
    %75 = vector.extract_strided_slice %29 {offsets = [3, 0], sizes = [1, 256], strides = [1, 1]} : vector<18x256xf32> to vector<1x256xf32>
    %76 = vector.shape_cast %75 : vector<1x256xf32> to vector<256xf32>
    %77 = vector.shape_cast %76 : vector<256xf32> to vector<1x256xf32>
    %78 = vector.broadcast %77 : vector<1x256xf32> to vector<2x256xf32>
    %79 = arith.mulf %78, %73 : vector<2x256xf32>
    %80 = arith.addf %72, %79 : vector<2x256xf32>
    %81 = vector.extract_strided_slice %29 {offsets = [12, 0], sizes = [1, 256], strides = [1, 1]} : vector<18x256xf32> to vector<1x256xf32>
    %82 = vector.shape_cast %81 : vector<1x256xf32> to vector<256xf32>
    %83 = vector.shape_cast %82 : vector<256xf32> to vector<1x256xf32>
    %84 = vector.broadcast %83 : vector<1x256xf32> to vector<2x256xf32>
    %85 = arith.mulf %84, %74 : vector<2x256xf32>
    %86 = arith.addf %80, %85 : vector<2x256xf32>
    %87 = vector.extract_strided_slice %29 {offsets = [4, 0], sizes = [1, 256], strides = [1, 1]} : vector<18x256xf32> to vector<1x256xf32>
    %88 = vector.shape_cast %87 : vector<1x256xf32> to vector<256xf32>
    %89 = vector.shape_cast %88 : vector<256xf32> to vector<1x256xf32>
    %90 = vector.broadcast %89 : vector<1x256xf32> to vector<2x256xf32>
    %91 = arith.mulf %90, %27 : vector<2x256xf32>
    %92 = arith.addf %86, %91 : vector<2x256xf32>
    %93 = vector.extract_strided_slice %29 {offsets = [13, 0], sizes = [1, 256], strides = [1, 1]} : vector<18x256xf32> to vector<1x256xf32>
    %94 = vector.shape_cast %93 : vector<1x256xf32> to vector<256xf32>
    %95 = vector.shape_cast %94 : vector<256xf32> to vector<1x256xf32>
    %96 = vector.broadcast %95 : vector<1x256xf32> to vector<2x256xf32>
    %97 = arith.mulf %96, %28 : vector<2x256xf32>
    %98 = arith.addf %92, %97 : vector<2x256xf32>
    %c255_i32 = arith.constant 255 : i32
    %99 = tpu.dynamic_rotate %27 by %c255_i32 dim 1 : vector<2x256xf32>, i32 -> vector<2x256xf32>
    %c255_i32_24 = arith.constant 255 : i32
    %100 = tpu.dynamic_rotate %28 by %c255_i32_24 dim 1 : vector<2x256xf32>, i32 -> vector<2x256xf32>
    %101 = vector.extract_strided_slice %29 {offsets = [5, 0], sizes = [1, 256], strides = [1, 1]} : vector<18x256xf32> to vector<1x256xf32>
    %102 = vector.shape_cast %101 : vector<1x256xf32> to vector<256xf32>
    %103 = vector.shape_cast %102 : vector<256xf32> to vector<1x256xf32>
    %104 = vector.broadcast %103 : vector<1x256xf32> to vector<2x256xf32>
    %105 = arith.mulf %104, %99 : vector<2x256xf32>
    %106 = arith.addf %98, %105 : vector<2x256xf32>
    %107 = vector.extract_strided_slice %29 {offsets = [14, 0], sizes = [1, 256], strides = [1, 1]} : vector<18x256xf32> to vector<1x256xf32>
    %108 = vector.shape_cast %107 : vector<1x256xf32> to vector<256xf32>
    %109 = vector.shape_cast %108 : vector<256xf32> to vector<1x256xf32>
    %110 = vector.broadcast %109 : vector<1x256xf32> to vector<2x256xf32>
    %111 = arith.mulf %110, %100 : vector<2x256xf32>
    %112 = arith.addf %106, %111 : vector<2x256xf32>
    %c241_i32 = arith.constant 241 : i32
    %113 = tpu.dynamic_rotate %27 by %c241_i32 dim 1 : vector<2x256xf32>, i32 -> vector<2x256xf32>
    %c241_i32_25 = arith.constant 241 : i32
    %114 = tpu.dynamic_rotate %28 by %c241_i32_25 dim 1 : vector<2x256xf32>, i32 -> vector<2x256xf32>
    %115 = vector.extract_strided_slice %29 {offsets = [6, 0], sizes = [1, 256], strides = [1, 1]} : vector<18x256xf32> to vector<1x256xf32>
    %116 = vector.shape_cast %115 : vector<1x256xf32> to vector<256xf32>
    %117 = vector.shape_cast %116 : vector<256xf32> to vector<1x256xf32>
    %118 = vector.broadcast %117 : vector<1x256xf32> to vector<2x256xf32>
    %119 = arith.mulf %118, %113 : vector<2x256xf32>
    %120 = arith.addf %112, %119 : vector<2x256xf32>
    %121 = vector.extract_strided_slice %29 {offsets = [15, 0], sizes = [1, 256], strides = [1, 1]} : vector<18x256xf32> to vector<1x256xf32>
    %122 = vector.shape_cast %121 : vector<1x256xf32> to vector<256xf32>
    %123 = vector.shape_cast %122 : vector<256xf32> to vector<1x256xf32>
    %124 = vector.broadcast %123 : vector<1x256xf32> to vector<2x256xf32>
    %125 = arith.mulf %124, %114 : vector<2x256xf32>
    %126 = arith.addf %120, %125 : vector<2x256xf32>
    %c240_i32 = arith.constant 240 : i32
    %127 = tpu.dynamic_rotate %27 by %c240_i32 dim 1 : vector<2x256xf32>, i32 -> vector<2x256xf32>
    %c240_i32_26 = arith.constant 240 : i32
    %128 = tpu.dynamic_rotate %28 by %c240_i32_26 dim 1 : vector<2x256xf32>, i32 -> vector<2x256xf32>
    %129 = vector.extract_strided_slice %29 {offsets = [7, 0], sizes = [1, 256], strides = [1, 1]} : vector<18x256xf32> to vector<1x256xf32>
    %130 = vector.shape_cast %129 : vector<1x256xf32> to vector<256xf32>
    %131 = vector.shape_cast %130 : vector<256xf32> to vector<1x256xf32>
    %132 = vector.broadcast %131 : vector<1x256xf32> to vector<2x256xf32>
    %133 = arith.mulf %132, %127 : vector<2x256xf32>
    %134 = arith.addf %126, %133 : vector<2x256xf32>
    %135 = vector.extract_strided_slice %29 {offsets = [16, 0], sizes = [1, 256], strides = [1, 1]} : vector<18x256xf32> to vector<1x256xf32>
    %136 = vector.shape_cast %135 : vector<1x256xf32> to vector<256xf32>
    %137 = vector.shape_cast %136 : vector<256xf32> to vector<1x256xf32>
    %138 = vector.broadcast %137 : vector<1x256xf32> to vector<2x256xf32>
    %139 = arith.mulf %138, %128 : vector<2x256xf32>
    %140 = arith.addf %134, %139 : vector<2x256xf32>
    %c239_i32 = arith.constant 239 : i32
    %141 = tpu.dynamic_rotate %27 by %c239_i32 dim 1 : vector<2x256xf32>, i32 -> vector<2x256xf32>
    %c239_i32_27 = arith.constant 239 : i32
    %142 = tpu.dynamic_rotate %28 by %c239_i32_27 dim 1 : vector<2x256xf32>, i32 -> vector<2x256xf32>
    %143 = vector.extract_strided_slice %29 {offsets = [8, 0], sizes = [1, 256], strides = [1, 1]} : vector<18x256xf32> to vector<1x256xf32>
    %144 = vector.shape_cast %143 : vector<1x256xf32> to vector<256xf32>
    %145 = vector.shape_cast %144 : vector<256xf32> to vector<1x256xf32>
    %146 = vector.broadcast %145 : vector<1x256xf32> to vector<2x256xf32>
    %147 = arith.mulf %146, %141 : vector<2x256xf32>
    %148 = arith.addf %140, %147 : vector<2x256xf32>
    %149 = vector.extract_strided_slice %29 {offsets = [17, 0], sizes = [1, 256], strides = [1, 1]} : vector<18x256xf32> to vector<1x256xf32>
    %150 = vector.shape_cast %149 : vector<1x256xf32> to vector<256xf32>
    %151 = vector.shape_cast %150 : vector<256xf32> to vector<1x256xf32>
    %152 = vector.broadcast %151 : vector<1x256xf32> to vector<2x256xf32>
    %153 = arith.mulf %152, %142 : vector<2x256xf32>
    %154 = arith.addf %148, %153 : vector<2x256xf32>
    %cst_28 = arith.constant 0.000000e+00 : f32
    %155 = vector.broadcast %cst_28 : f32 to vector<2x256xf32>
    %156 = arith.subf %155, %154 : vector<2x256xf32>
    %157 = math.exp %156 : vector<2x256xf32>
    %cst_29 = arith.constant 1.000000e+00 : f32
    %158 = vector.broadcast %cst_29 : f32 to vector<2x256xf32>
    %159 = arith.addf %158, %157 : vector<2x256xf32>
    %cst_30 = arith.constant 1.000000e+00 : f32
    %160 = vector.broadcast %cst_30 : f32 to vector<2x256xf32>
    %161 = arith.divf %160, %159 : vector<2x256xf32>
    %162 = vector.shape_cast %161 : vector<2x256xf32> to vector<2x1x256xf32>
    %163 = vector.broadcast %162 : vector<2x1x256xf32> to vector<2x16x256xf32>
    %164 = arith.mulf %24, %163 : vector<2x16x256xf32>
    %c0_31 = arith.constant 0 : index
    %c0_32 = arith.constant 0 : index
    %c0_33 = arith.constant 0 : index
    %165 = vector.load %arg5[%c0_31, %c0_32, %c0_33] : memref<2x16x256xf32, #tpu.memory_space<vmem>>, vector<2x16x256xf32>
    tpu.vector_store %arg5[%c0_31, %c0_32, %c0_33], %164 {strides = array<i32>} : memref<2x16x256xf32, #tpu.memory_space<vmem>>, vector<2x16x256xf32>,
    return
  }
  func.func @transform_0(%arg0: i32) -> (i32, i32, i32) {
    %c0_i32 = arith.constant 0 : i32
    %c0_i32_0 = arith.constant 0 : i32
    %c0_i32_1 = arith.constant 0 : i32
    return %arg0, %c0_i32, %c0_i32_0 : i32, i32, i32
  }
  func.func @transform_1(%arg0: i32) -> (i32, i32) {
    %c0_i32 = arith.constant 0 : i32
    %c0_i32_0 = arith.constant 0 : i32
    %c0_i32_1 = arith.constant 0 : i32
    return %c0_i32, %c0_i32_0 : i32, i32
  }
  func.func @transform_2(%arg0: i32) -> (i32, i32) {
    %c0_i32 = arith.constant 0 : i32
    %c0_i32_0 = arith.constant 0 : i32
    %c0_i32_1 = arith.constant 0 : i32
    return %c0_i32, %c0_i32_0 : i32, i32
  }
  func.func @transform_3(%arg0: i32) -> (i32, i32) {
    %c0_i32 = arith.constant 0 : i32
    %c0_i32_0 = arith.constant 0 : i32
    %c0_i32_1 = arith.constant 0 : i32
    return %c0_i32, %c0_i32_0 : i32, i32
  }
  func.func @transform_4(%arg0: i32) -> (i32, i32, i32) {
    %c0_i32 = arith.constant 0 : i32
    %c0_i32_0 = arith.constant 0 : i32
    %c0_i32_1 = arith.constant 0 : i32
    return %arg0, %c0_i32, %c0_i32_0 : i32, i32, i32
  }
}

</mosaic_0001>

<bundles_post_ra>
// kernel: tpu_custom_call.1
= control target key start
LH: loop header
LB: loop body
LE: loop exit
PB: predicated region body
PF: predicated region fallthrough
CT: control target
= control target key end

     0   :  { %9 = vsyncpa [#allocation3], 0  ;;  %s1984_s0 = inlined_call_operand.hbm [shape: f32[4,16,256], index: 0, kind: input, shape index: {}]   ;;  %s1985_s1 = inlined_call_operand.vmem [shape: f32[16,2], index: 1, kind: input, shape index: {}]   ;;  %s1986_s2 = inlined_call_operand.vmem [shape: f32[2,16], index: 2, kind: input, shape index: {}]   ;;  %s1987_s3 = inlined_call_operand.hbm [shape: f32[18,256], index: 3, kind: input, shape index: {}]   ;;  %s1988_s4 = inlined_call_operand.hbm [shape: f32[4,16,256], index: 4, kind: output, shape index: {}]  }
   0x1   :  { %11 = vsyncpa [#allocation3 + $0x1], 0 }
   0x2   :  { %12 = vsyncpa [#allocation6], 0 }
   0x3   :  { %13 = vsyncpa [#allocation4], 0 }
   0x4   :  { %15 = vsyncpa [#allocation4 + $0x1], 0  ;;  %s1396_s15 = smov 0   ;;  %s1398_s16 = smov 0  }
   0x5   :  { %s1400_s17 = smov 0   ;;  %s1402_s18 = smov 0  }
   0x6 LB: > { %s1417_s19 = sadd.s32 4294967295, %s1351_s18   ;;  %s1094_s20 = sadd.s32 4294967294, %s1351_s18   ;;  %s1351_s18 = sphi %s1402_s18, %s2008_s18   ;;  %s1347_s17 = sphi %s1400_s17, %s2007_s17   ;;  %s1343_s16 = sphi %s1398_s16, %s2006_s16   ;;  %s1339_s15 = sphi %s1396_s15, %s2005_s15  }
   0x7   : > { %p41_p0 = scmp.ne.s32.totalorder %s1343_s16, %s1339_s15  ;;  %p1989_p1 = scmp.eq.s32.totalorder %s1417_s19, 0 }
   0x8   : > { %p134_p3 = scmp.eq.s32.totalorder %s1094_s20, 1  ;;  %p1095_p5 = scmp.ge.s32.totalorder %s1351_s18, 1 }
   0x9   : > { %p1426_p4 = por %p1989_p1, %p41_p0  ;;  %p141_p7 = scmp.lt.s32.totalorder %s1351_s18, 3 }
   0xa   : > { %p1431_p6 = por %p134_p3, %p41_p0  ;;  %s1353_s24 = smov [#allocation5]  }
   0xb   : > { %s1992_s21 = scalar_select %p1426_p4, 1, 0 }
   0xc   : > { %s1993_s22 = scalar_select %p1431_p6, 1, 0 }
   0xd   : > { %p1436_p8 = pnand %p1095_p5, %p141_p7  ;;  %s159_s25 = sshll.u32 %s1353_s24, 4  ;;  %s1440_s25 = int_to_ptr.vmem [resolvable:$true] %s159_s25 }
   0xe   : > { %s1452_s27 = sadd.s32 1, %s1351_s18   ;;  %s28_s28 = sadd.s32 1, %s1347_s17 }
   0xf   : > { %s1994_s23 = scalar_select %p1436_p8, 1, 0 }
  0x10   : > { %p1147_p9 = pneg %p1436_p8  ;;  %s25_s29 = ssub.s32 %s1351_s18, %s1452_s27 }
  0x11   : > { %s1223_s6 = scalar_lea.hbm %s1987_s3, 768 }
  0x12   : > { %p1447_p11 = pnand %p1147_p9, %p1989_p1  ;;  %p1224_p12 = scmp.ne.s32.totalorder %s1987_s3, %s1223_s6 }
  0x13   : > { %p1230_p5 = scmp.lt.u32.totalorder %s1223_s6, %s1987_s3 }
  0x14   : > { %p1225_p13 = pneg %p1447_p11 }
  0x16   : > { %p1226_p0 = pnand %p1225_p13, %p1224_p12 }
  0x18   : > { %p1227_p3 = pneg %p1226_p0 }
  0x1a   : > { %p1232_p7 = pnand %p1230_p5, %p1227_p3 }
  0x1c   : > { %1235 = shalt.err (!%p1232_p7)
}
  0x1d   : > { %s1236_s11 = scalar_lea.vmem %s1440_s25, 768  ;;  %p1244_p2 = scmp.lt.s32.totalorder %s1440_s25, %s1440_s25 }
  0x1e   : > { %p1237_p9 = scmp.ne.s32.totalorder %s1440_s25, %s1236_s11  ;;  %p1245_p6 = scmp.lt.s32.totalorder %s1236_s11, %s1236_s11 }
  0x20   : > { %p1239_p10 = pnand %p1237_p9, %p1225_p13  ;;  %p1246_p4 = por %p1245_p6, %p1244_p2 }
  0x22   : > { %p1240_p1 = pneg %p1239_p10 }
  0x24   : > { %p1247_p8 = pnand %p1246_p4, %p1240_p1 }
  0x26   : > { %1250 = shalt.err (!%p1247_p8)
}
  0x27   : > { %s1354_s12 = smov 256   ;;  %s1355_s13 = smov 16  }
  0x28   : > { %1150 = dma.hbm_to_vmem [thread:$0]  (!%p1447_p11), %s1987_s3, 768, %s1440_s25, [#allocation6], %s1354_s12, %s1354_s12, %s1355_s13  }
  0x29   : > { %p26_p1 = scmp.eq.s32.totalorder %s25_s29, 0  ;;  %p35_p2 = scmp.ne.s32.totalorder %s1347_s17, %s1343_s16 }
  0x2a   : > { %p36_p4 = scmp.eq.s32.totalorder %s1351_s18, 0  ;;  %p1160_p6 = scmp.lt.s32.totalorder %s1351_s18, 2 }
  0x2b   : > { %s1486_s24 = scalar_select %p26_p1, %s1347_s17, %s28_s28  }
  0x2c   : > { %p37_p8 = por %p36_p4, %p35_p2  ;;  %p1996_p10 = scmp.eq.s32.totalorder %s1417_s19, 1 }
  0x2d   : > { %s173_s26 = sand.u32 1, %s1347_s17   ;;  %s1116_s5 = sshll.u32 %s1351_s18, 10 }
  0x2e   : > { %p1490_p12 = por %p1996_p10, %p35_p2  ;;  %s1098_s6 = sshll.u32 %s173_s26, 6 }
  0x2f   : > { %s1499_s9 = scalar_lea.hbm %s1984_s0, %s1116_s5  ;;  %s177_s25 = scalar_lea.vmem [#allocation2], %s1098_s6 }
  0x30   : > { %s185_s28 = sshll.u32 %s177_s25, 4  ;;  %p1501_p11 = pnand %p1160_p6, %p37_p8  ;;  %s1505_s28 = int_to_ptr.vmem [resolvable:$true] %s185_s28 }
  0x31   : > { %s1507_s10 = scalar_lea.sflag [#allocation3], %s173_s26  ;;  %s1251_s11 = scalar_lea.hbm %s1499_s9, 1024 }
  0x32   : > { %p1252_p13 = scmp.ne.s32.totalorder %s1499_s9, %s1251_s11  ;;  %p1253_p0 = pneg %p1501_p11 }
  0x33   : > { %s1256_s5 = scalar_lea.hbm %s1984_s0, 2048  ;;  %p1257_p7 = scmp.lt.u32.totalorder %s1499_s9, %s1984_s0 }
  0x34   : > { %p1254_p3 = pnand %p1253_p0, %p1252_p13  ;;  %p1258_p9 = scmp.lt.u32.totalorder %s1256_s5, %s1251_s11 }
  0x35   : > { %p1260_p2 = scmp.lt.u32.totalorder %s1251_s11, %s1499_s9 }
  0x36   : > { %p1255_p5 = pneg %p1254_p3  ;;  %p1259_p1 = por %p1258_p9, %p1257_p7 }
  0x38   : > { %p1261_p4 = por %p1260_p2, %p1259_p1 }
  0x3a   : > { %p1262_p6 = pnand %p1261_p4, %p1255_p5 }
  0x3c   : > { %1265 = shalt.err (!%p1262_p6)
}
  0x3d   : > { %s1266_s26 = scalar_lea.vmem %s1505_s28, 1024  ;;  %s1356_s8 = smov [#allocation2]  }
  0x3e   : > { %p1267_p8 = scmp.ne.s32.totalorder %s1505_s28, %s1266_s26  ;;  %s1271_s25 = sshll.u32 %s1356_s8, 4  ;;  %s1272_s25 = int_to_ptr.vmem [resolvable:$false] %s1271_s25 }
  0x3f   : > { %s1273_s14 = scalar_lea.vmem %s1272_s25, 2048  ;;  %p1274_p3 = scmp.lt.s32.totalorder %s1505_s28, %s1272_s25 }
  0x40   : > { %p1269_p10 = pnand %p1267_p8, %p1253_p0  ;;  %p1275_p7 = scmp.lt.s32.totalorder %s1273_s14, %s1266_s26 }
  0x42   : > { %p1270_p13 = pneg %p1269_p10  ;;  %p1276_p9 = por %p1275_p7, %p1274_p3 }
  0x44   : > { %p1277_p1 = pnand %p1276_p9, %p1270_p13 }
  0x46   : > { %1280 = shalt.err (!%p1277_p1)
}
  0x47   : > { %1154 = dma.hbm_to_vmem [thread:$0]  (!%p1501_p11), %s1499_s9, 1024, %s1505_s28, %s1507_s10, %s1354_s12, %s1354_s12, %s1355_s13  }
  0x48   : > { %p1999_p0 = scmp.ne.s32.totalorder %s1994_s23, 0 }
  0x49   : > { %s1541_s11 = sand.u32 (!%p1999_p0), 1, %s1343_s16   ;;  %p2000_p5 = scmp.ne.s32.totalorder (!%p1999_p0), %s1992_s21, 0 }
  0x4a   : > { %197 = sbr.rel (%p1999_p0) target bundleno = 1086 (0x43e), region = 36  ;;  %s1103_s20 = sshll.u32 (!%p1999_p0), %s1541_s11, 6 }
  0x4b   : > { %s200_s5 = scalar_lea.sflag (!%p1999_p0), [#allocation3], %s1541_s11  ;;  %s203_s29 = scalar_lea.vmem (!%p1999_p0), [#allocation2], %s1103_s20 }
  0x51   : > { %1326 = dma.done.wait (%p2000_p5), %s200_s5, 1024  }
  0x52   : > { %1328 = vsyncadd (%p2000_p5), %s200_s5, 4294966272  ;;  %p2001_p11 = scmp.eq.s32.totalorder %s1417_s19, 0 }
  0x54   : > { %1330 = dma.done.wait (%p2001_p11), [#allocation6], 768   ;;  %p2002_p2 = pmov %p2001_p11 }
  0x55   : > { %v1555_v0 = vld [vmem:[%s203_s29 + $0x20] sm:$0xff]  ;;  %v1557_v1 = vld [vmem:[%s203_s29 + $0x28] sm:$0xff]  ;;  %v1565_v5 = vld [vmem:[%s203_s29 + $0x30] sm:$0xff]  ;;  %v1357_v19 = vmov 0.0|0.0   ;;  %vm1358_vm0 = vmmov 0   ;;  %v1359_v20 = vmov 0.0   ;;  %v274_v21 = vlaneseq }
  0x56   : > { %1332 = vsyncadd (%p2002_p2), [#allocation6], 4294966528  ;;  %v1559_v2 = vld [vmem:[%s203_s29] sm:$0xff]  ;;  %v248_v3 = vadd.f32 %v1557_v1, %v1555_v0  ;;  %v1563_v4 = vld [vmem:[%s203_s29 + $0x8] sm:$0xff]  ;;  %v264_v15 = vmax.f32 %v1555_v0, %v1557_v1  ;;  %1136 = vmatprep.subr.bf16.mxu0 %v1357_v19  ;;  %1128 = vmatprep.mubr.msk.f32.mxu0 %vm1358_vm0, %v1359_v20  ;;  %vm285_vm1 = vcmask 130112   ;;  %vm296_vm2 = vcmask 1041409  }
  0x57   : > { %v1567_v6 = vld [vmem:[%s203_s29 + $0x38] sm:$0xff]  ;;  %v242_v7 = vadd.f32 %v1563_v4, %v1559_v2  ;;  %v1571_v8 = vld [vmem:[%s203_s29 + $0x10] sm:$0xff]  ;;  %v258_v13 = vmax.f32 %v1559_v2, %v1563_v4  ;;  %v326_v16 = vld [vmem:[%s1985_s1] sm:$0xff]  ;;  %1131 = vmatprep.subr.mxu1 %v1359_v20  ;;  %1133 = vmatprep.mubr.msk.f32.mxu1 %vm1358_vm0, %v1359_v20  ;;  %v1593_v22 = vand.u32 127, %v274_v21  ;;  %v1596_v26 = vshrl.u32 %v274_v21, 7  ;;  %s1360_s10 = smov 17  }
  0x58   : > { %v1573_v9 = vld [vmem:[%s203_s29 + $0x18] sm:$0xff]  ;;  %249 = vadd.xlane.f32.xlu1 %v248_v3  ;;  %v251_v10 = vadd.f32 %v1567_v6, %v1565_v5  ;;  %v267_v14 = vmax.f32 %v1565_v5, %v1567_v6  ;;  %v327_v17 = vld [vmem:[%s1985_s1 + $0x8] sm:$0xff]  ;;  %vm321_vm3 = vcmask 1043459   ;;  %vm324_vm4 = vcmask 1041408   ;;  %v403_v54 = vld [vmem:[%s1986_s2] sm:$0x3] }
  0x59   : > { %243 = vadd.xlane.f32.xlu0 %v242_v7  ;;  %v245_v11 = vadd.f32 %v1573_v9, %v1571_v8  ;;  %v261_v12 = vmax.f32 %v1571_v8, %v1573_v9  ;;  %v1137_v18 = vpack.c.bf16 %v327_v17, %v326_v16  ;;  %v280_v25 = vadd.s32 4294967288, %v1593_v22  ;;  %1132 = vmatpush3.msk.msra.mxu1 %vm324_vm4, %v403_v54  ;;  %s1361_s6 = smov 16   ;;  %s1362_s7 = smov 15  }
  0x5a   : > { %v278_v32 = vsub.s32 %v1593_v22, %v1596_v26  ;;  %vm328_vm5 = vcmask 130048   ;;  %vm404_vm6 = vcmask 15360   ;;  %s1363_s26 = smov 1   ;;  %s1364_s8 = smov 127   ;;  %vm599_vm7 = vcmp.lt.s32.totalorder %v1593_v22, 17 }
  0x5b   : > { %1138 = vmatpush3.bf16.msra.mxu0 %v1137_v18  ;;  %v283_v29 = vsub.s32 %v280_v25, %v1596_v26  ;;  %s1365_s25 = smov 113   ;;  %s1366_s14 = smov 112   ;;  %vm644_vm8 = vcmp.lt.s32.totalorder %v1593_v22, 16  ;;  %vm681_vm9 = vcmp.lt.s32.totalorder %v1593_v22, 15  ;;  %vm718_vm10 = vcmp.lt.s32.totalorder %v1593_v22, 1 }
  0x5c   : > { %252 = vadd.xlane.f32.xlu1 %v251_v10  ;;  %v1606_v10 = vsub.s32 0, %v1596_v26  ;;  %s1367_s5 = smov 111   ;;  %vm779_vm11 = vcmp.lt.s32.totalorder %v1593_v22, 127  ;;  %vm816_vm12 = vcmp.lt.s32.totalorder %v1593_v22, 113  ;;  %vm853_vm13 = vcmp.lt.s32.totalorder %v1593_v22, 112  ;;  %s1118_s29 = sshll.u32 %s1417_s19, 10 }
  0x5d   : > { %246 = vadd.xlane.f32.xlu0 %v245_v11  ;;  %vm890_vm14 = vcmp.lt.s32.totalorder %v1593_v22, 111  ;;  %v1368_v22 = vmov 1966171168   ;;  %s231_s21 = scalar_lea.vmem [#allocation7], %s1103_s20  ;;  %s1933_s19 = scalar_lea.hbm %s1988_s4, %s1118_s29 }
  0x5e   : > { %s1011_s23 = sshll.u32 %s231_s21, 4  ;;  %s997_s20 = scalar_lea.sflag [#allocation4], %s1541_s11  ;;  %s1939_s23 = int_to_ptr.vmem [resolvable:$true] %s1011_s23 }
  0x5f   : > { %s1281_s9 = scalar_lea.vmem %s1939_s23, 1024  ;;  %s1369_s28 = smov [#allocation7]  }
  0x60   : > { %262 = vmax.xlane.f32.xlu1 %v261_v12  ;;  %p1282_p4 = scmp.ne.s32.totalorder %s1939_s23, %s1281_s9 }
  0x61   : > { %259 = vmax.xlane.f32.xlu0 %v258_v13  ;;  %v1610_v13 = vsub.s32 1, %v1596_v26 }
  0x62   : > { %p1283_p6 = pnand %p1282_p4, %p1490_p12 }
  0x64   : > { %268 = vmax.xlane.f32.xlu1 %v267_v14  ;;  %p1284_p8 = pneg %p1283_p6 }
  0x65   : > { %265 = vmax.xlane.f32.xlu0 %v264_v15 }
  0xe5   : > { %v250_v23 = vpop.xlane.xlu1 %249 }
  0xe6   : > { %v244_v24 = vpop.xlane.xlu0 %243  ;;  %v256_v33 = vmul.f32 0.00390625, %v250_v23 }
  0xe7   : > { %v254_v34 = vmul.f32 0.00390625, %v244_v24 }
  0xe8   : > { %v290_v39 = vrot.slane %v256_v33, %v278_v32 }
  0xe9   : > { %v253_v27 = vpop.xlane.xlu1 %252  ;;  %v279_v40 = vrot.slane %v254_v34, %v278_v32 }
  0xea   : > { %v247_v28 = vpop.xlane.xlu0 %246  ;;  %v257_v30 = vmul.f32 0.00390625, %v253_v27 }
  0xeb   : > { %v255_v31 = vmul.f32 0.00390625, %v247_v28 }
  0xec   : > { %v294_v37 = vrot.slane %v257_v30, %v283_v29 }
  0xed   : > { %v263_v35 = vpop.xlane.xlu1 %262  ;;  %v284_v38 = vrot.slane %v255_v31, %v283_v29 }
  0xee   : > { %v260_v36 = vpop.xlane.xlu0 %259  ;;  %v310_v41 = vrot.slane %v263_v35, %v283_v29  ;;  %v295_v46 = vsel %vm285_vm1, %v294_v37, %v290_v39 }
  0xef   : > { %v306_v42 = vrot.slane %v260_v36, %v278_v32  ;;  %v286_v47 = vsel %vm285_vm1, %v284_v38, %v279_v40 }
  0xf0   : > { %v297_v51 = vsel %vm296_vm2, %v295_v46, %v286_v47 }
  0xf1   : > { %v269_v43 = vpop.xlane.xlu1 %268  ;;  %v311_v49 = vsel %vm285_vm1, %v310_v41, %v306_v42 }
  0xf2   : > { %v319_v44 = vrot.slane %v269_v43, %v283_v29  ;;  %v266_v45 = vpop.xlane.xlu0 %265 }
  0xf3   : > { %v315_v48 = vrot.slane %v266_v45, %v278_v32 }
  0xf5   : > { %v320_v50 = vsel %vm285_vm1, %v319_v44, %v315_v48 }
  0xf6   : > { %v322_v52 = vsel %vm321_vm3, %v320_v50, %v311_v49 }
  0xf7   : > { %v325_v53 = vsel %vm324_vm4, %v297_v51, %v322_v52 }
  0xf8   : > { %1129 = vmatmul.mubr.msk.f32.vlgmr.msra.gmra.mrb[0].mxu0 %vm328_vm5, %v325_v53 }
 0x1cb   : > { %v398_v55 = vpop.f32.mrb[0].mxu0 }
 0x1cc   : > { %v402_v56 = vmax.f32 %v398_v55, 0.0  ;;  %v1130_v57 = vpop.f32.mrb[1].mxu0 }
 0x1ce   : > { %1134 = vmatmul.mubr.msk.f32.vlgmr.msra.gmra.mrb[0].mxu1 %vm404_vm6, %v402_v56 }
 0x2a1   : > { %v477_v58 = vpop.f32.mrb[0].mxu1 }
 0x2a2   : > { %v482_v59 = vrot.slane %v477_v58, 2  ;;  %v1135_v60 = vpop.f32.mrb[1].mxu1 }
 0x2a4   : > { %v484_v61 = vadd.f32 %v482_v59, %v477_v58 }
 0x2a6   : > { %v485_v62 = vsub.f32 0.0, %v484_v61 }
 0x2a8   : > { %v486_v63 = vmul.f32 1.442695, %v485_v62 }
 0x2aa   : > { %1211 = vpow2.f32 %v486_v63 }
 0x2b4   : > { %v1212_v3 = vpop.eup %1211 }
 0x2b5   : > { %v488_v7 = vadd.f32 1.0, %v1212_v3 }
 0x2b7   : > { %1213 = vrcp.f32 %v488_v7 }
 0x2c1   : > { %v1214_v11 = vpop.eup %1213 }
 0x2c2   : > { %v494_v12 = vrot.slane %v1214_v11, %v1606_v10  ;;  %v505_v14 = vrot.slane %v1214_v11, %v1610_v13 }
 0x2c4   : > { %500 = vbcast.lane.b32.xlu1 %v494_v12, 264  ;;  %496 = vbcast.lane.b32.xlu0 %v494_v12, 256 }
 0x2c8   : > { %507 = vbcast.lane.b32.xlu1 %v505_v14, 256 }
 0x2cc   : > { %511 = vbcast.lane.b32.xlu1 %v505_v14, 264 }
 0x336   : > { %v501_v15 = vpop.permute.xlu1 %500  ;;  %v497_v16 = vpop.permute.xlu0 %496 }
 0x337   : > { %v1614_v17 = vmul.f32 %v501_v15, %v1571_v8  ;;  %v1617_v18 = vmul.f32 %v501_v15, %v1573_v9  ;;  %v1620_v19 = vmul.f32 %v497_v16, %v1559_v2  ;;  %v1623_v20 = vmul.f32 %v497_v16, %v1563_v4 }
 0x339   : > { %v553_v21 = vmax.f32 %v1620_v19, %v1614_v17  ;;  %v560_v23 = vmax.f32 %v1623_v20, %v1617_v18  ;;  %v521_v41 = vadd.f32 %v1614_v17, %v1620_v19  ;;  %v528_v42 = vadd.f32 %v1617_v18, %v1623_v20 }
 0x33a   : > { %v508_v24 = vpop.permute.xlu1 %507 }
 0x33b   : > { %v554_v25 = vrot.slane %v553_v21, 4  ;;  %v561_v27 = vrot.slane %v560_v23, 4  ;;  %v1630_v9 = vmul.f32 %v508_v24, %v1555_v0  ;;  %v1633_v2 = vmul.f32 %v508_v24, %v1557_v1 }
 0x33c   : > { %v522_v51 = vrot.slane %v521_v41, 4  ;;  %v529_v52 = vrot.slane %v528_v42, 4 }
 0x33d   : > { %v555_v8 = vmax.f32 %v553_v21, %v554_v25  ;;  %v562_v28 = vmax.f32 %v560_v23, %v561_v27 }
 0x33e   : > { %v512_v29 = vpop.permute.xlu1 %511  ;;  %v523_v61 = vadd.f32 %v522_v51, %v521_v41  ;;  %v530_v62 = vadd.f32 %v529_v52, %v528_v42 }
 0x33f   : > { %v1636_v4 = vmul.f32 %v512_v29, %v1565_v5  ;;  %v1639_v30 = vmul.f32 %v512_v29, %v1567_v6  ;;  %v556_v31 = vrot.slane %v555_v8, 2  ;;  %v563_v32 = vrot.slane %v562_v28, 2 }
 0x340   : > { %v524_v7 = vrot.slane %v523_v61, 2  ;;  %v531_v11 = vrot.slane %v530_v62, 2 }
 0x341   : > { %v567_v33 = vmax.f32 %v1630_v9, %v1636_v4  ;;  %v574_v34 = vmax.f32 %v1633_v2, %v1639_v30  ;;  %v557_v36 = vmax.f32 %v555_v8, %v556_v31  ;;  %v564_v37 = vmax.f32 %v562_v28, %v563_v32 }
 0x342   : > { %v535_v5 = vadd.f32 %v1636_v4, %v1630_v9  ;;  %v542_v6 = vadd.f32 %v1639_v30, %v1633_v2  ;;  %v525_v15 = vadd.f32 %v524_v7, %v523_v61  ;;  %v532_v16 = vadd.f32 %v531_v11, %v530_v62 }
 0x343   : > { %v568_v35 = vrot.slane %v567_v33, 4  ;;  %v575_v0 = vrot.slane %v574_v34, 4  ;;  %v558_v43 = vrot.slane %v557_v36, 1  ;;  %v565_v44 = vrot.slane %v564_v37, 1 }
 0x344   : > { %v536_v47 = vrot.slane %v535_v5, 4  ;;  %v543_v48 = vrot.slane %v542_v6, 4  ;;  %v526_v24 = vrot.slane %v525_v15, 1  ;;  %v533_v25 = vrot.slane %v532_v16, 1 }
 0x345   : > { %v569_v1 = vmax.f32 %v567_v33, %v568_v35  ;;  %v576_v38 = vmax.f32 %v574_v34, %v575_v0  ;;  %v559_v53 = vmax.f32 %v557_v36, %v558_v43  ;;  %v566_v54 = vmax.f32 %v564_v37, %v565_v44  ;;  %v1724_v44 = vld [vmem:[#allocation5 + $0x10] sm:$0xff] }
 0x346   : > { %v537_v57 = vadd.f32 %v536_v47, %v535_v5  ;;  %v544_v58 = vadd.f32 %v543_v48, %v542_v6  ;;  %v527_v28 = vadd.f32 %v526_v24, %v525_v15  ;;  %v534_v29 = vadd.f32 %v533_v25, %v532_v16 }
 0x347   : > { %v570_v39 = vrot.slane %v569_v1, 2  ;;  %v577_v40 = vrot.slane %v576_v38, 2  ;;  %v1722_v43 = vsub.s32 5, %v1596_v26 }
 0x348   : > { %v538_v63 = vrot.slane %v537_v57, 2  ;;  %v545_v3 = vrot.slane %v544_v58, 2  ;;  %v549_v33 = vmul.f32 0.0625, %v527_v28  ;;  %v550_v34 = vmul.f32 0.0625, %v534_v29 }
 0x349   : > { %v571_v45 = vmax.f32 %v569_v1, %v570_v39  ;;  %v578_v46 = vmax.f32 %v576_v38, %v577_v40 }
 0x34a   : > { %v539_v12 = vadd.f32 %v538_v63, %v537_v57  ;;  %v546_v14 = vadd.f32 %v545_v3, %v544_v58  ;;  %v631_v57 = vrot.slane %v1724_v44, %v1610_v13 }
 0x34b   : > { %v572_v49 = vrot.slane %v571_v45, 1  ;;  %v579_v50 = vrot.slane %v578_v46, 1 }
 0x34c   : > { %v540_v21 = vrot.slane %v539_v12, 1  ;;  %v547_v23 = vrot.slane %v546_v14, 1 }
 0x34d   : > { %v573_v55 = vmax.f32 %v571_v45, %v572_v49  ;;  %v580_v56 = vmax.f32 %v578_v46, %v579_v50  ;;  %v1726_v45 = vld [vmem:[#allocation5 + $0x18] sm:$0xff]  ;;  %v1729_v46 = vsub.s32 4, %v1596_v26  ;;  %v1735_v49 = vld [vmem:[#allocation5] sm:$0xff]  ;;  %v1737_v50 = vld [vmem:[#allocation5 + $0x8] sm:$0xff] }
 0x34e   : > { %v541_v27 = vadd.f32 %v540_v21, %v539_v12  ;;  %v548_v8 = vadd.f32 %v547_v23, %v546_v14  ;;  %v619_v51 = vrot.slane %v1735_v49, %v1606_v10  ;;  %v623_v52 = vrot.slane %v1737_v50, %v1606_v10 }
 0x34f   : > { %v1654_v59 = vsel %vm296_vm2, %v573_v55, %v559_v53  ;;  %v1657_v60 = vsel %vm296_vm2, %v580_v56, %v566_v54  ;;  %v667_v53 = vsub.s32 2, %v1596_v26  ;;  %v1746_v54 = vsub.s32 3, %v1596_v26 }
 0x350   : > { %612 = vrot.lane.b32.xlu1 %v1657_v60, %s1360_s10  ;;  %610 = vrot.lane.b32.xlu0 %v1654_v59, %s1360_s10  ;;  %v551_v31 = vmul.f32 0.0625, %v541_v27  ;;  %v552_v32 = vmul.f32 0.0625, %v548_v8  ;;  %v766_v55 = vrot.slane %v1724_v44, %v1722_v43  ;;  %v770_v56 = vrot.slane %v1726_v45, %v1722_v43 }
 0x351   : > { %v635_v58 = vrot.slane %v1726_v45, %v1610_v13  ;;  %v754_v63 = vrot.slane %v1735_v49, %v1729_v46  ;;  %v656_v16 = vrot.slane %v1735_v49, %v1610_v13  ;;  %v660_v21 = vrot.slane %v1737_v50, %v1610_v13 }
 0x352   : > { %v1678_v35 = vsel %vm296_vm2, %v551_v31, %v549_v33  ;;  %v1681_v0 = vsel %vm296_vm2, %v552_v32, %v550_v34  ;;  %v668_v23 = vrot.slane %v1724_v44, %v667_v53  ;;  %v672_v24 = vrot.slane %v1726_v45, %v667_v53 }
 0x353   : > { %v705_v25 = vrot.slane %v1724_v44, %v1746_v54  ;;  %v693_v31 = vrot.slane %v1735_v49, %v667_v53  ;;  %v697_v32 = vrot.slane %v1737_v50, %v667_v53  ;;  %v730_v53 = vrot.slane %v1735_v49, %v1746_v54 }
 0x354   : > { %649 = vrot.lane.b32.xlu1 %v1657_v60, %s1361_s6  ;;  %647 = vrot.lane.b32.xlu0 %v1654_v59, %s1361_s6 }
 0x358   : > { %686 = vrot.lane.b32.xlu1 %v1657_v60, %s1362_s7  ;;  %684 = vrot.lane.b32.xlu0 %v1654_v59, %s1362_s7 }
 0x35c   : > { %723 = vrot.lane.b32.xlu1 %v1657_v60, %s1363_s26  ;;  %721 = vrot.lane.b32.xlu0 %v1654_v59, %s1363_s26 }
 0x360   : > { %784 = vrot.lane.b32.xlu1 %v1657_v60, %s1364_s8  ;;  %782 = vrot.lane.b32.xlu0 %v1654_v59, %s1364_s8 }
 0x364   : > { %821 = vrot.lane.b32.xlu1 %v1657_v60, %s1365_s25  ;;  %819 = vrot.lane.b32.xlu0 %v1654_v59, %s1365_s25 }
 0x368   : > { %597 = vrot.lane.b32.xlu1 %v1681_v0, %s1360_s10  ;;  %595 = vrot.lane.b32.xlu0 %v1678_v35, %s1360_s10  ;;  %s1285_s10 = sshll.u32 %s1369_s28, 4  ;;  %s1286_s10 = int_to_ptr.vmem [resolvable:$false] %s1285_s10 }
 0x369   : > { %p1288_p10 = scmp.lt.s32.totalorder %s1939_s23, %s1286_s10 }
 0x36c   : > { %642 = vrot.lane.b32.xlu1 %v1681_v0, %s1361_s6  ;;  %640 = vrot.lane.b32.xlu0 %v1678_v35, %s1361_s6 }
 0x370   : > { %679 = vrot.lane.b32.xlu1 %v1681_v0, %s1362_s7  ;;  %677 = vrot.lane.b32.xlu0 %v1678_v35, %s1362_s7  ;;  %s1287_s7 = scalar_lea.vmem %s1286_s10, 2048 }
 0x371   : > { %p1289_p13 = scmp.lt.s32.totalorder %s1287_s7, %s1281_s9 }
 0x373   : > { %p1290_p3 = por %p1289_p13, %p1288_p10 }
 0x374   : > { %716 = vrot.lane.b32.xlu1 %v1681_v0, %s1363_s26  ;;  %714 = vrot.lane.b32.xlu0 %v1678_v35, %s1363_s26 }
 0x375   : > { %p1291_p7 = pnand %p1290_p3, %p1284_p8 }
 0x378   : > { %858 = vrot.lane.b32.xlu1 %v1657_v60, %s1366_s14  ;;  %856 = vrot.lane.b32.xlu0 %v1654_v59, %s1366_s14 }
 0x37c   : > { %777 = vrot.lane.b32.xlu1 %v1681_v0, %s1364_s8  ;;  %775 = vrot.lane.b32.xlu0 %v1678_v35, %s1364_s8 }
 0x380   : > { %814 = vrot.lane.b32.xlu1 %v1681_v0, %s1365_s25  ;;  %812 = vrot.lane.b32.xlu0 %v1678_v35, %s1365_s25 }
 0x384   : > { %851 = vrot.lane.b32.xlu1 %v1681_v0, %s1366_s14  ;;  %849 = vrot.lane.b32.xlu0 %v1678_v35, %s1366_s14 }
 0x388   : > { %888 = vrot.lane.b32.xlu1 %v1681_v0, %s1367_s5  ;;  %886 = vrot.lane.b32.xlu0 %v1678_v35, %s1367_s5 }
 0x38c   : > { %895 = vrot.lane.b32.xlu1 %v1657_v60, %s1367_s5  ;;  %893 = vrot.lane.b32.xlu0 %v1654_v59, %s1367_s5 }
 0x3c2   : > { %v613_v36 = vpop.permute.xlu1 %612  ;;  %v611_v37 = vpop.permute.xlu0 %610 }
 0x3c3   : > { %v614_v3 = vsel %vm599_vm7, %v611_v37, %v613_v36  ;;  %v615_v7 = vsel %vm599_vm7, %v613_v36, %v611_v37 }
 0x3c4   : > { %v636_v27 = vmul.f32 %v631_v57, %v615_v7  ;;  %v637_v8 = vmul.f32 %v635_v58, %v614_v3 }
 0x3c6   : > { %v650_v1 = vpop.permute.xlu1 %649  ;;  %v648_v38 = vpop.permute.xlu0 %647 }
 0x3c7   : > { %v651_v33 = vsel %vm644_vm8, %v648_v38, %v650_v1  ;;  %v652_v34 = vsel %vm644_vm8, %v650_v1, %v648_v38  ;;  %v734_v1 = vrot.slane %v1737_v50, %v1746_v54 }
 0x3c8   : > { %v673_v38 = vmul.f32 %v668_v23, %v652_v34 }
 0x3ca   : > { %v1709_v5 = vpop.permute.xlu1 %686  ;;  %v1711_v6 = vpop.permute.xlu0 %684 }
 0x3ce   : > { %v1713_v39 = vpop.permute.xlu1 %723  ;;  %v1715_v40 = vpop.permute.xlu0 %721 }
 0x3d2   : > { %v1717_v41 = vpop.permute.xlu1 %784  ;;  %v1719_v42 = vpop.permute.xlu0 %782 }
 0x3d6   : > { %v1731_v47 = vpop.permute.xlu1 %821  ;;  %v1733_v48 = vpop.permute.xlu0 %819 }
 0x3da   : > { %v598_v61 = vpop.permute.xlu1 %597  ;;  %v596_v62 = vpop.permute.xlu0 %595 }
 0x3db   : > { %v600_v11 = vsel %vm599_vm7, %v596_v62, %v598_v61  ;;  %v601_v12 = vsel %vm599_vm7, %v598_v61, %v596_v62  ;;  %v709_v61 = vrot.slane %v1726_v45, %v1746_v54  ;;  %v674_v62 = vmul.f32 %v672_v24, %v651_v33 }
 0x3dc   : > { %v624_v14 = vmul.f32 %v619_v51, %v601_v12  ;;  %v625_v15 = vmul.f32 %v623_v52, %v600_v11 }
 0x3de   : > { %v643_v28 = vpop.permute.xlu1 %642  ;;  %v641_v29 = vpop.permute.xlu0 %640  ;;  %v638_v51 = vadd.f32 %v636_v27, %v624_v14  ;;  %v639_v52 = vadd.f32 %v637_v8, %v625_v15  ;;  %v688_v14 = vsel %vm681_vm9, %v1711_v6, %v1709_v5  ;;  %v689_v15 = vsel %vm681_vm9, %v1709_v5, %v1711_v6 }
 0x3df   : > { %v645_v36 = vsel %vm644_vm8, %v641_v29, %v643_v28  ;;  %v646_v37 = vsel %vm644_vm8, %v643_v28, %v641_v29  ;;  %v742_v8 = vrot.slane %v1724_v44, %v1729_v46  ;;  %v746_v28 = vrot.slane %v1726_v45, %v1729_v46 }
 0x3e0   : > { %v661_v57 = vmul.f32 %v656_v16, %v646_v37  ;;  %v662_v58 = vmul.f32 %v660_v21, %v645_v36  ;;  %v1810_v29 = vsub.s32 6, %v1596_v26  ;;  %v758_v5 = vrot.slane %v1737_v50, %v1729_v46 }
 0x3e1   : > { %v710_v6 = vmul.f32 %v705_v25, %v689_v15  ;;  %v711_v33 = vmul.f32 %v709_v61, %v688_v14 }
 0x3e2   : > { %v663_v3 = vadd.f32 %v661_v57, %v638_v51  ;;  %v664_v7 = vadd.f32 %v662_v58, %v639_v52  ;;  %v680_v11 = vpop.permute.xlu1 %679  ;;  %v678_v12 = vpop.permute.xlu0 %677  ;;  %v760_v15 = vmul.f32 %v758_v5, %v1681_v0 }
 0x3e3   : > { %v682_v16 = vsel %vm681_vm9, %v678_v12, %v680_v11  ;;  %v683_v54 = vsel %vm681_vm9, %v680_v11, %v678_v12 }
 0x3e4   : > { %v675_v21 = vadd.f32 %v673_v38, %v663_v3  ;;  %v676_v23 = vadd.f32 %v674_v62, %v664_v7  ;;  %v698_v24 = vmul.f32 %v693_v31, %v683_v54  ;;  %v699_v27 = vmul.f32 %v697_v32, %v682_v16 }
 0x3e5   : > { %v725_v31 = vsel %vm718_vm10, %v1715_v40, %v1713_v39  ;;  %v726_v32 = vsel %vm718_vm10, %v1713_v39, %v1715_v40  ;;  %v1827_v62 = vsub.s32 7, %v1596_v26  ;;  %v771_v3 = vmul.f32 %v766_v55, %v1654_v59 }
 0x3e6   : > { %v700_v34 = vadd.f32 %v698_v24, %v675_v21  ;;  %v701_v36 = vadd.f32 %v699_v27, %v676_v23  ;;  %v717_v37 = vpop.permute.xlu1 %716  ;;  %v715_v51 = vpop.permute.xlu0 %714  ;;  %v772_v39 = vmul.f32 %v770_v56, %v1657_v60  ;;  %v747_v40 = vmul.f32 %v742_v8, %v726_v32  ;;  %v586_v32 = vld [vmem:[#allocation5 + $0x28] sm:$0x3] }
 0x3e7   : > { %v719_v52 = vsel %vm718_vm10, %v715_v51, %v717_v37  ;;  %v720_v25 = vsel %vm718_vm10, %v717_v37, %v715_v51  ;;  %v748_v7 = vmul.f32 %v746_v28, %v725_v31  ;;  %v759_v59 = vmul.f32 %v754_v63, %v1678_v35  ;;  %v1856_v35 = vld [vmem:[#allocation5 + $0x20] sm:$0x3] }
 0x3e8   : > { %v712_v57 = vadd.f32 %v710_v6, %v700_v34  ;;  %v713_v58 = vadd.f32 %v711_v33, %v701_v36  ;;  %v735_v61 = vmul.f32 %v730_v53, %v720_v25  ;;  %v736_v38 = vmul.f32 %v734_v1, %v719_v52 }
 0x3e9   : > { %v803_v1 = vrot.slane %v1724_v44, %v1810_v29  ;;  %v791_v56 = vrot.slane %v1735_v49, %v1722_v43  ;;  %v795_v16 = vrot.slane %v1737_v50, %v1722_v43  ;;  %v807_v54 = vrot.slane %v1726_v45, %v1810_v29 }
 0x3ea   : > { %v737_v11 = vadd.f32 %v735_v61, %v712_v57  ;;  %v738_v12 = vadd.f32 %v736_v38, %v713_v58  ;;  %v859_v14 = vpop.permute.xlu1 %858  ;;  %v857_v53 = vpop.permute.xlu0 %856  ;;  %v840_v0 = vrot.slane %v1724_v44, %v1827_v62  ;;  %v844_v46 = vrot.slane %v1726_v45, %v1827_v62 }
 0x3eb   : > { %v828_v43 = vrot.slane %v1735_v49, %v1810_v29  ;;  %v832_v27 = vrot.slane %v1737_v50, %v1810_v29  ;;  %v786_v8 = vsel %vm779_vm11, %v1719_v42, %v1717_v41  ;;  %v787_v28 = vsel %vm779_vm11, %v1717_v41, %v1719_v42 }
 0x3ec   : > { %v749_v55 = vadd.f32 %v747_v40, %v737_v11  ;;  %v750_v60 = vadd.f32 %v748_v7, %v738_v12  ;;  %v877_v37 = vrot.slane %v1856_v35, %v1606_v10  ;;  %v865_v51 = vrot.slane %v1735_v49, %v1827_v62 }
 0x3ed   : > { %v869_v41 = vrot.slane %v1737_v50, %v1827_v62  ;;  %v808_v42 = vmul.f32 %v803_v1, %v786_v8  ;;  %v809_v31 = vmul.f32 %v807_v54, %v787_v28  ;;  %v823_v61 = vsel %vm816_vm12, %v1733_v48, %v1731_v47 }
 0x3ee   : > { %v778_v63 = vpop.permute.xlu1 %777  ;;  %v762_v21 = vadd.f32 %v760_v15, %v750_v60  ;;  %v776_v23 = vpop.permute.xlu0 %775  ;;  %v761_v24 = vadd.f32 %v759_v59, %v749_v55  ;;  %v824_v49 = vsel %vm816_vm12, %v1731_v47, %v1733_v48  ;;  %v881_v7 = vrot.slane %v586_v32, %v1606_v10 }
 0x3ef   : > { %v780_v5 = vsel %vm779_vm11, %v776_v23, %v778_v63  ;;  %v781_v6 = vsel %vm779_vm11, %v778_v63, %v776_v23  ;;  %v902_v11 = vrot.slane %v1724_v44, %v1606_v10  ;;  %v906_v47 = vrot.slane %v1726_v45, %v1606_v10 }
 0x3f0   : > { %v774_v33 = vadd.f32 %v772_v39, %v762_v21  ;;  %v773_v34 = vadd.f32 %v771_v3, %v761_v24  ;;  %v796_v36 = vmul.f32 %v791_v56, %v780_v5  ;;  %v797_v29 = vmul.f32 %v795_v16, %v781_v6 }
 0x3f1   : > { %v845_v48 = vmul.f32 %v840_v0, %v823_v61  ;;  %v846_v12 = vmul.f32 %v844_v46, %v824_v49  ;;  %v860_v60 = vsel %vm853_vm13, %v857_v53, %v859_v14  ;;  %v861_v56 = vsel %vm853_vm13, %v859_v14, %v857_v53 }
 0x3f2   : > { %v798_v52 = vadd.f32 %v796_v36, %v773_v34  ;;  %v799_v25 = vadd.f32 %v797_v29, %v774_v33  ;;  %v815_v57 = vpop.permute.xlu1 %814  ;;  %v813_v58 = vpop.permute.xlu0 %812  ;;  %v882_v63 = vmul.f32 %v877_v37, %v860_v60  ;;  %v883_v21 = vmul.f32 %v881_v7, %v861_v56 }
 0x3f3   : > { %v817_v50 = vsel %vm816_vm12, %v813_v58, %v815_v57  ;;  %v818_v38 = vsel %vm816_vm12, %v815_v57, %v813_v58  ;;  %v914_v53 = vrot.slane %v1856_v35, %v1610_v13  ;;  %v918_v28 = vrot.slane %v586_v32, %v1610_v13 }
 0x3f4   : > { %v811_v62 = vadd.f32 %v809_v31, %v799_v25  ;;  %v810_v3 = vadd.f32 %v808_v42, %v798_v52  ;;  %v833_v39 = vmul.f32 %v828_v43, %v817_v50  ;;  %v834_v40 = vmul.f32 %v832_v27, %v818_v38 }
 0x3f6   : > { %v835_v1 = vadd.f32 %v833_v39, %v810_v3  ;;  %v836_v15 = vadd.f32 %v834_v40, %v811_v62  ;;  %v852_v59 = vpop.permute.xlu1 %851  ;;  %v850_v55 = vpop.permute.xlu0 %849  ;;  %v939_v3 = vunpack.c.l.s4 %v1368_v22 }
 0x3f7   : > { %v854_v16 = vsel %vm853_vm13, %v850_v55, %v852_v59  ;;  %v855_v44 = vsel %vm853_vm13, %v852_v59, %v850_v55 }
 0x3f8   : > { %v848_v54 = vadd.f32 %v846_v12, %v836_v15  ;;  %v847_v45 = vadd.f32 %v845_v48, %v835_v1  ;;  %v870_v0 = vmul.f32 %v865_v51, %v854_v16  ;;  %v871_v46 = vmul.f32 %v869_v41, %v855_v44 }
 0x3f9   : > { %v940_v39 = vunpack.c.0.s8 %v939_v3 }
 0x3fa   : > { %v872_v23 = vadd.f32 %v870_v0, %v847_v45  ;;  %v873_v24 = vadd.f32 %v871_v46, %v848_v54  ;;  %v889_v43 = vpop.permute.xlu1 %888  ;;  %v887_v27 = vpop.permute.xlu0 %886 }
 0x3fb   : > { %v891_v8 = vsel %vm890_vm14, %v887_v27, %v889_v43  ;;  %v892_v14 = vsel %vm890_vm14, %v889_v43, %v887_v27  ;;  %v943_v7 = vsub.s32 %v940_v39, %v1596_v26 }
 0x3fc   : > { %v885_v5 = vadd.f32 %v883_v21, %v873_v24  ;;  %v884_v6 = vadd.f32 %v882_v63, %v872_v23  ;;  %v907_v33 = vmul.f32 %v902_v11, %v891_v8  ;;  %v908_v34 = vmul.f32 %v906_v47, %v892_v14 }
 0x3fe   : > { %v896_v36 = vpop.permute.xlu1 %895  ;;  %v894_v29 = vpop.permute.xlu0 %893  ;;  %v909_v41 = vadd.f32 %v907_v33, %v884_v6  ;;  %v910_v42 = vadd.f32 %v908_v34, %v885_v5 }
 0x3ff   : > { %v897_v37 = vsel %vm890_vm14, %v894_v29, %v896_v36  ;;  %v898_v51 = vsel %vm890_vm14, %v896_v36, %v894_v29 }
 0x400   : > { %v919_v31 = vmul.f32 %v914_v53, %v897_v37  ;;  %v920_v52 = vmul.f32 %v918_v28, %v898_v51 }
 0x402   : > { %v921_v25 = vadd.f32 %v919_v31, %v909_v41  ;;  %v922_v35 = vadd.f32 %v920_v52, %v910_v42 }
 0x404   : > { %v923_v57 = vsub.f32 0.0, %v921_v25  ;;  %v924_v32 = vsub.f32 0.0, %v922_v35 }
 0x406   : > { %v925_v58 = vmul.f32 1.442695, %v923_v57  ;;  %v927_v61 = vmul.f32 1.442695, %v924_v32 }
 0x408   : > { %1215 = vpow2.f32 %v925_v58 }
 0x409   : > { %1217 = vpow2.f32 %v927_v61 }
 0x412   : > { %v1216_v49 = vpop.eup %1215 }
 0x413   : > { %v1218_v50 = vpop.eup %1217  ;;  %v929_v38 = vadd.f32 1.0, %v1216_v49 }
 0x414   : > { %v930_v62 = vadd.f32 1.0, %v1218_v50 }
 0x415   : > { %1219 = vrcp.f32 %v929_v38 }
 0x416   : > { %1221 = vrcp.f32 %v930_v62 }
 0x41f   : > { %v1220_v40 = vpop.eup %1219 }
 0x420   : > { %v1222_v11 = vpop.eup %1221 }
 0x421   : > { %v937_v47 = vcombine.low %v1220_v40, %v1222_v11 }
 0x423   : > { %v944_v48 = vrot.slane %v937_v47, %v943_v7 }
 0x425   : > { %v945_v12 = vcombine.high %v944_v48, %v944_v48  ;;  %v952_v1 = vrot.slane %v944_v48, %v943_v7 }
 0x427   : > { %v959_v15 = vrot.slane %v945_v12, %v943_v7  ;;  %v963_v59 = vrot.slane %v952_v1, %v1606_v10  ;;  %v967_v55 = vrot.slane %v952_v1, %v1610_v13 }
 0x429   : > { %v971_v60 = vrot.slane %v959_v15, %v1606_v10  ;;  %v975_v56 = vrot.slane %v959_v15, %v1610_v13  ;;  %v980_v26 = vmul.f32 %v963_v59, %v1620_v19  ;;  %v981_v16 = vmul.f32 %v967_v55, %v1623_v20 }
 0x42a   : > { %v982_v44 = vmul.f32 %v963_v59, %v1614_v17  ;;  %v983_v54 = vmul.f32 %v967_v55, %v1617_v18 }
 0x42b   : > { %v984_v45 = vmul.f32 %v971_v60, %v1630_v9  ;;  %v985_v10 = vmul.f32 %v975_v56, %v1633_v2  ;;  %v986_v13 = vmul.f32 %v971_v60, %v1636_v4  ;;  %v987_v19 = vmul.f32 %v975_v56, %v1639_v30  ;;  %988 = vst [vmem:[%s231_s21] sm:$0xff] %v980_v26 }
 0x42c   : > { %989 = vst [vmem:[%s231_s21 + $0x8] sm:$0xff] %v981_v16  ;;  %990 = vst [vmem:[%s231_s21 + $0x10] sm:$0xff] %v982_v44 }
 0x42d   : > { %991 = vst [vmem:[%s231_s21 + $0x18] sm:$0xff] %v983_v54  ;;  %992 = vst [vmem:[%s231_s21 + $0x20] sm:$0xff] %v984_v45 }
 0x42e   : > { %993 = vst [vmem:[%s231_s21 + $0x28] sm:$0xff] %v985_v10  ;;  %994 = vst [vmem:[%s231_s21 + $0x30] sm:$0xff] %v986_v13 }
 0x42f   : > { %995 = vst [vmem:[%s231_s21 + $0x38] sm:$0xff] %v987_v19 }
 0x430   : > { %1294 = shalt.err (!%p1291_p7)
}
 0x431   : > { %s1295_s26 = scalar_lea.hbm %s1933_s19, 1024  ;;  %s1299_s14 = scalar_lea.hbm %s1988_s4, 2048 }
 0x432   : > { %p1296_p9 = scmp.ne.s32.totalorder %s1933_s19, %s1295_s26  ;;  %p1300_p5 = scmp.lt.u32.totalorder %s1933_s19, %s1988_s4 }
 0x433   : > { %p1301_p11 = scmp.lt.u32.totalorder %s1299_s14, %s1295_s26  ;;  %p1303_p4 = scmp.lt.u32.totalorder %s1295_s26, %s1933_s19 }
 0x434   : > { %p1297_p1 = pnand %p1296_p9, %p1490_p12 }
 0x435   : > { %p1302_p2 = por %p1301_p11, %p1300_p5 }
 0x436   : > { %p1298_p0 = pneg %p1297_p1 }
 0x437   : > { %p1304_p6 = por %p1303_p4, %p1302_p2 }
 0x439   : > { %p1305_p8 = pnand %p1304_p6, %p1298_p0 }
 0x43b   : > { %1308 = shalt.err (!%p1305_p8)
}
 0x43c   : > { %s1370_s21 = smov 256  }
 0x43d   : > { %1145 = dma.vmem_to_hbm [thread:$0]  (%p1490_p12), %s1939_s23, 1024, %s1933_s19, %s997_s20, %s1370_s21, %s1370_s21, %s1361_s6  }
 0x43e PF: > { %s1026_s12 = sand.u32 1, %s1339_s15   ;;  %p2003_p10 = scmp.ne.s32.totalorder %s1993_s22, 0 }
 0x43f   : > { %p2004_p13 = scmp.ge.s32.totalorder %s1351_s18, 2  ;;  %s1027_s13 = scalar_lea.sflag [#allocation4], %s1026_s12 }
 0x441   : > { %p1156_p3 = pnand %p2004_p13, %p2003_p10 }
 0x443   : > { %1334 = dma.done.wait (!%p1156_p3), %s1027_s13, 1024  }
 0x444   : > { %1336 = vsyncadd (!%p1156_p3), %s1027_s13, 4294966272  ;;  %p18_p7 = scmp.ge.s32.totalorder %s1452_s27, 4   ;;  %s2005_s15 = smov %s1343_s16 }
 0x445   : > { %s2006_s16 = smov %s1347_s17  ;;  %s2007_s17 = smov %s1486_s24 }
 0x446   : > { %s2008_s18 = smov %s1452_s27  ;;  %20 = sbr.rel (!%p18_p7) target bundleno = 6 (0x6), region = 85 }
 0x44d   :  { %1032 = vsyncpa [#allocation3], 1 }
 0x44e   :  { %1034 = vsyncpa [#allocation3 + $0x1], 1 }
 0x44f   :  { %1035 = vsyncpa [#allocation6], 1 }
 0x450   :  { %1036 = vsyncpa [#allocation4], 1 }
 0x451   :  { %1038 = vsyncpa [#allocation4 + $0x1], 1 }

</bundles_post_ra>
